<compile_context>
chip_gen: v5e
topology: v5e:2x2
jax: 0.10.0
libtpu: 0.0.40
codegen_flags: <defaults>
</compile_context>

<pallas_src>
import functools
import math

import jax
import jax.numpy as jnp
from jax.experimental import pallas as pl
from jax.experimental.pallas import tpu as pltpu


def transformer_kernel(
    x_ref, emb_w_ref, emb_b_ref,
    vw_ref, vb_ref, outw_ref, outb_ref,
    ln1w_ref, ln1b_ref, ln2w_ref, ln2b_ref,
    l1w_ref, l1b_ref, l2w_ref, l2b_ref,
    fcw_ref, fcb_ref,
    out_ref, h_ref,
    *, tanh_gelu, ffn_bf16,
):
    bf16 = jnp.bfloat16
    l = pl.program_id(1)

    # Embedding Linear only at the first layer step.  (PositionalEncoding
    # buffer is identically zero for this module and dropout is identity at
    # inference, so "+ pe"/dropout are exact no-ops and dropped.)
    @pl.when(l == 0)
    def _():
        h_ref[...] = (jnp.dot(x_ref[...].astype(bf16), emb_w_ref[...],
                              preferred_element_type=jnp.float32)
                      + emb_b_ref[...])

    def layer_norm(y, w, b):
        # Two-pass variance (matches PyTorch; avoids E[x^2]-mu^2 cancellation).
        mu = jnp.mean(y, axis=-1, keepdims=True)
        c = y - mu
        var = jnp.mean(c * c, axis=-1, keepdims=True)
        return c * (jax.lax.rsqrt(var + 1e-5) * w) + b

    h = h_ref[...]

    # --- pre-norm self-attention block ---
    # seq_len == 1 -> softmax(q k^T / sqrt(dk)) == 1 exactly, so
    # MHA(y, y, y) == out_proj(V_proj(y)); Q/K weights never reach the kernel.
    y = layer_norm(h, ln1w_ref[0], ln1b_ref[0])
    v = (jnp.dot(y.astype(bf16), vw_ref[0],
                 preferred_element_type=jnp.float32) + vb_ref[0])
    attn = (jnp.dot(v.astype(bf16), outw_ref[0],
                    preferred_element_type=jnp.float32) + outb_ref[0])
    h = h + attn

    # --- pre-norm feed-forward block ---
    y = layer_norm(h, ln2w_ref[0], ln2b_ref[0])
    f = jnp.dot(y.astype(bf16), l1w_ref[0], preferred_element_type=jnp.float32)
    if ffn_bf16:
        # bias-add + GELU on the big (bm, ff) tensor at bf16 (v6e/v7x native);
        # set ffn_bf16=False on v5e (no bf16 VPU/EUP there).
        f = f.astype(bf16) + l1b_ref[0].astype(bf16)
        f = jax.nn.gelu(f, approximate=tanh_gelu)
    else:
        f = jax.nn.gelu(f + l1b_ref[0], approximate=tanh_gelu).astype(bf16)
    h = h + (jnp.dot(f, l2w_ref[0], preferred_element_type=jnp.float32)
             + l2b_ref[0])

    h_ref[...] = h

    # Classifier at the last layer step; fcw/fcb are zero-padded to a
    # lane-dense (>=128) output so the store is an unmasked vst.
    @pl.when(l == pl.num_programs(1) - 1)
    def _():
        out_ref[...] = (jnp.dot(h.astype(bf16), fcw_ref[...],
                                preferred_element_type=jnp.float32)
                        + fcb_ref[...]).astype(out_ref.dtype)


def _cdiv(a, b):
    return -(-a // b)


def _round_up(a, b):
    return _cdiv(a, b) * b


def _pick_bm(B, target=512):
    """MXU-friendly batch tile (multiple of 8, up to `target`) while keeping
    the batch grid >= 2 whenever possible so v7x's two TensorCores both get
    work and input/output tiles pipeline."""
    bm = min(target, _round_up(_cdiv(B, 2), 8))
    return max(bm, 8)


def _vmem_budget_bytes(bm, input_dim, D, ff, nc_pad, out_itemsize):
    bf, f32 = 2, 4
    # Per-layer streamed blocks (double-buffered by the pipeline).
    per_layer = ((2 * D * D + 2 * D * ff) * bf        # vw, outw, l1w, l2w
                 + (7 * D + ff) * f32)                # biases + LN params
    const_w = ((input_dim * D + D * nc_pad) * bf      # emb_wT, fcw
               + (D + nc_pad) * f32)                  # emb_b, fcb
    io_tiles = bm * input_dim * f32 + bm * nc_pad * out_itemsize
    scratch = bm * D * f32
    # In-flight activations: one (bm, ff) f32 accumulator + bf16 copy, a
    # handful of (bm, D) f32 temporaries, plus slack.
    act = bm * ff * (f32 + bf) + 6 * bm * D * f32 + (2 << 20)
    total = 2 * (per_layer + const_w + io_tiles) + scratch + act
    # Floor above the default scoped limits, cap below v7x's 64 MiB physical.
    return int(min(max(total, 32 << 20), 64 << 20))


def prepare_params(params):
    """One-time layout/dtype prep (do NOT call per forward): bf16 weight
    casts, V-only in_proj slice, lane-dense padded classifier, biases/LN
    reshaped to (L, 1, X) so per-layer blocks have tiling-legal trailing dims."""
    bf16 = jnp.bfloat16
    L, D = params["ln1_w"].shape
    num_classes = params["fc_b"].shape[-1]
    nc_pad = max(128, _round_up(num_classes, 128))

    def per_layer_vec(b):
        return b.reshape(L, 1, -1).astype(jnp.float32)

    fcw = (jnp.zeros((D, nc_pad), jnp.float32)
           .at[:, :num_classes].set(params["fc_wT"]).astype(bf16))
    fcb = (jnp.zeros((1, nc_pad), jnp.float32)
           .at[:, :num_classes].set(params["fc_b"]))

    return {
        "emb_wT": params["emb_wT"].astype(bf16),                    # (in, D)
        "emb_b": params["emb_b"].astype(jnp.float32),               # (1, D)
        "vw": params["inproj_wT"][:, :, 2 * D:3 * D].astype(bf16),  # (L, D, D)
        "vb": per_layer_vec(params["inproj_b"][:, 2 * D:3 * D]),    # (L, 1, D)
        "outw": params["outproj_wT"].astype(bf16),                  # (L, D, D)
        "outb": per_layer_vec(params["outproj_b"]),
        "ln1w": per_layer_vec(params["ln1_w"]),
        "ln1b": per_layer_vec(params["ln1_b"]),
        "ln2w": per_layer_vec(params["ln2_w"]),
        "ln2b": per_layer_vec(params["ln2_b"]),
        "l1w": params["lin1_wT"].astype(bf16),                      # (L, D, ff)
        "l1b": per_layer_vec(params["lin1_b"]),
        "l2w": params["lin2_wT"].astype(bf16),                      # (L, ff, D)
        "l2b": per_layer_vec(params["lin2_b"]),
        "fcw": fcw,                                                 # (D, ncp)
        "fcb": fcb,                                                 # (1, ncp)
        "num_classes": num_classes,
    }


def transformer_forward(x, prep, *, bm=None, bm_target=512, use_tanh_gelu=True,
                        ffn_bf16=True, out_dtype=jnp.float32):
    B, input_dim = x.shape
    L, _, D = prep["ln1w"].shape
    ff = prep["l1b"].shape[-1]
    nc_pad = prep["fcb"].shape[-1]
    num_classes = prep["num_classes"]

    if bm is None:
        bm = _pick_bm(B, target=bm_target)
    B_pad = _round_up(B, bm)
    if B_pad != B:
        x = jnp.pad(x, ((0, B_pad - B), (0, 0)))
    n_bt = B_pad // bm

    inputs = [
        x,
        prep["emb_wT"], prep["emb_b"],
        prep["vw"], prep["vb"], prep["outw"], prep["outb"],
        prep["ln1w"], prep["ln1b"], prep["ln2w"], prep["ln2b"],
        prep["l1w"], prep["l1b"], prep["l2w"], prep["l2b"],
        prep["fcw"], prep["fcb"],
    ]

    def const_spec(a):
        nd = a.ndim
        return pl.BlockSpec(tuple(a.shape), lambda i, l: (0,) * nd)

    def layer_spec(a):
        zeros = (0,) * (a.ndim - 1)
        return pl.BlockSpec((1,) + tuple(a.shape[1:]),
                            lambda i, l: (l,) + zeros)

    in_specs = [
        pl.BlockSpec((bm, input_dim), lambda i, l: (i, 0)),
        const_spec(prep["emb_wT"]), const_spec(prep["emb_b"]),
        layer_spec(prep["vw"]), layer_spec(prep["vb"]),
        layer_spec(prep["outw"]), layer_spec(prep["outb"]),
        layer_spec(prep["ln1w"]), layer_spec(prep["ln1b"]),
        layer_spec(prep["ln2w"]), layer_spec(prep["ln2b"]),
        layer_spec(prep["l1w"]), layer_spec(prep["l1b"]),
        layer_spec(prep["l2w"]), layer_spec(prep["l2b"]),
        const_spec(prep["fcw"]), const_spec(prep["fcb"]),
    ]
    out_specs = pl.BlockSpec((bm, nc_pad), lambda i, l: (i, 0))

    out_itemsize = jnp.dtype(out_dtype).itemsize
    vmem_limit = _vmem_budget_bytes(bm, input_dim, D, ff, nc_pad, out_itemsize)

    cost = pl.CostEstimate(
        flops=2 * B_pad * (input_dim * D + L * (2 * D * D + 2 * D * ff)
                           + D * nc_pad),
        transcendentals=B_pad * L * ff,
        bytes_accessed=int(sum(int(a.size) * a.dtype.itemsize for a in inputs)
                           + B_pad * nc_pad * out_itemsize),
    )

    out = pl.pallas_call(
        functools.partial(transformer_kernel, tanh_gelu=use_tanh_gelu,
                          ffn_bf16=ffn_bf16),
        out_shape=jax.ShapeDtypeStruct((B_pad, nc_pad), out_dtype),
        grid_spec=pltpu.PrefetchScalarGridSpec(
            num_scalar_prefetch=0,
            grid=(n_bt, L),
            in_specs=in_specs,
            out_specs=out_specs,
            scratch_shapes=[pltpu.VMEM((bm, D), jnp.float32)],
        ),
        compiler_params=pltpu.CompilerParams(
            dimension_semantics=("parallel", "arbitrary"),
            vmem_limit_bytes=vmem_limit),
        cost_estimate=cost,
    )(*inputs)

    return out[:B, :num_classes]


def _xavier_uniform(key, out_dim, in_dim):
    bound = math.sqrt(6.0 / (in_dim + out_dim))
    return jax.random.uniform(key, (out_dim, in_dim), jnp.float32, -bound, bound)


def _linear_bias(key, fan_in, out_dim):
    b = 1.0 / math.sqrt(fan_in)
    return jax.random.uniform(key, (out_dim,), jnp.float32, -b, b)


def init_params(key, input_dim, num_classes, d_model, num_layers, dim_ff):
    keys = iter(jax.random.split(key, 8 + 8 * num_layers))
    p = {}
    p["emb_wT"] = _xavier_uniform(next(keys), d_model, input_dim).T
    p["emb_b"] = _linear_bias(next(keys), input_dim, d_model)[None, :]

    inpw, inpb, outw, outb = [], [], [], []
    l1w, l1b, l2w, l2b = [], [], [], []
    for _ in range(num_layers):
        inpw.append(_xavier_uniform(next(keys), 3 * d_model, d_model).T)   # (D, 3D)
        inpb.append(jnp.zeros((3 * d_model,), jnp.float32))                # MHA bias default
        outw.append(_xavier_uniform(next(keys), d_model, d_model).T)
        outb.append(jnp.zeros((d_model,), jnp.float32))
        l1w.append(_xavier_uniform(next(keys), dim_ff, d_model).T)
        l1b.append(_linear_bias(next(keys), d_model, dim_ff))
        l2w.append(_xavier_uniform(next(keys), d_model, dim_ff).T)
        l2b.append(_linear_bias(next(keys), dim_ff, d_model))

    p["inproj_wT"] = jnp.stack(inpw)
    p["inproj_b"] = jnp.stack(inpb)
    p["outproj_wT"] = jnp.stack(outw)
    p["outproj_b"] = jnp.stack(outb)
    p["lin1_wT"] = jnp.stack(l1w)
    p["lin1_b"] = jnp.stack(l1b)
    p["lin2_wT"] = jnp.stack(l2w)
    p["lin2_b"] = jnp.stack(l2b)
    p["ln1_w"] = jnp.ones((num_layers, d_model), jnp.float32)
    p["ln1_b"] = jnp.zeros((num_layers, d_model), jnp.float32)
    p["ln2_w"] = jnp.ones((num_layers, d_model), jnp.float32)
    p["ln2_b"] = jnp.zeros((num_layers, d_model), jnp.float32)
    p["fc_wT"] = _xavier_uniform(next(keys), num_classes, d_model).T
    p["fc_b"] = _linear_bias(next(keys), d_model, num_classes)[None, :]
    return p


if __name__ == "__main__":
    # Small shapes consistent with the module's forward: x is (batch, input_dim).
    B, input_dim, num_classes = 8, 16, 8
    d_model, nhead, num_layers, dim_ff = 32, 4, 2, 64  # nhead only splits Q/K heads, a no-op at seq_len=1

    key = jax.random.PRNGKey(0)
    kx, kp = jax.random.split(key)
    x = jax.random.normal(kx, (B, input_dim), dtype=jnp.float32)

    params = init_params(kp, input_dim, num_classes, d_model, num_layers, dim_ff)
    prep = prepare_params(params)   # one-time weight prep, outside the forward path

    out = transformer_forward(x, prep)
    out = jax.block_until_ready(out)
    assert out.shape == (B, num_classes)
    assert bool(jnp.all(jnp.isfinite(out)))
    # TODO(synk): dropout layers are identity here (inference semantics); training-mode dropout not implemented.
    print("KERNEL_OK")
</pallas_src>

<mosaic_0001>
module attributes {stable_mosaic.version = 11 : i64} {
  func.func @transformer_kernel(%arg0: i32, %arg1: i32, %arg2: memref<8x16xf32, #tpu.memory_space<vmem>>, %arg3: memref<16x32xbf16, #tpu.memory_space<vmem>>, %arg4: memref<1x32xf32, #tpu.memory_space<vmem>>, %arg5: memref<1x32x32xbf16, #tpu.memory_space<vmem>>, %arg6: memref<1x1x32xf32, #tpu.memory_space<vmem>>, %arg7: memref<1x32x32xbf16, #tpu.memory_space<vmem>>, %arg8: memref<1x1x32xf32, #tpu.memory_space<vmem>>, %arg9: memref<1x1x32xf32, #tpu.memory_space<vmem>>, %arg10: memref<1x1x32xf32, #tpu.memory_space<vmem>>, %arg11: memref<1x1x32xf32, #tpu.memory_space<vmem>>, %arg12: memref<1x1x32xf32, #tpu.memory_space<vmem>>, %arg13: memref<1x32x64xbf16, #tpu.memory_space<vmem>>, %arg14: memref<1x1x64xf32, #tpu.memory_space<vmem>>, %arg15: memref<1x64x32xbf16, #tpu.memory_space<vmem>>, %arg16: memref<1x1x32xf32, #tpu.memory_space<vmem>>, %arg17: memref<32x128xbf16, #tpu.memory_space<vmem>>, %arg18: memref<1x128xf32, #tpu.memory_space<vmem>>, %arg19: memref<8x128xf32, #tpu.memory_space<vmem>>, %arg20: memref<8x32xf32, #tpu.memory_space<vmem>>) attributes {dimension_semantics = [#tpu.dimension_semantics<parallel>, #tpu.dimension_semantics<arbitrary>], iteration_bounds = array<i64: 1, 2>, scalar_prefetch = 0 : i64, scratch_operands = 1 : i64, tpu.core_type = #tpu.core_type<tc>, window_params = [{transform_indices = @transform_0, window_bounds = array<i64: 8, 16>}, {pipeline_mode = #tpu.pipeline_mode<synchronous>, transform_indices = @transform_1, window_bounds = array<i64: 16, 32>}, {pipeline_mode = #tpu.pipeline_mode<synchronous>, transform_indices = @transform_2, window_bounds = array<i64: 1, 32>}, {transform_indices = @transform_3, window_bounds = array<i64: 1, 32, 32>}, {transform_indices = @transform_4, window_bounds = array<i64: 1, 1, 32>}, {transform_indices = @transform_5, window_bounds = array<i64: 1, 32, 32>}, {transform_indices = @transform_6, window_bounds = array<i64: 1, 1, 32>}, {transform_indices = @transform_7, window_bounds = array<i64: 1, 1, 32>}, {transform_indices = @transform_8, window_bounds = array<i64: 1, 1, 32>}, {transform_indices = @transform_9, window_bounds = array<i64: 1, 1, 32>}, {transform_indices = @transform_10, window_bounds = array<i64: 1, 1, 32>}, {transform_indices = @transform_11, window_bounds = array<i64: 1, 32, 64>}, {transform_indices = @transform_12, window_bounds = array<i64: 1, 1, 64>}, {transform_indices = @transform_13, window_bounds = array<i64: 1, 64, 32>}, {transform_indices = @transform_14, window_bounds = array<i64: 1, 1, 32>}, {pipeline_mode = #tpu.pipeline_mode<synchronous>, transform_indices = @transform_15, window_bounds = array<i64: 32, 128>}, {pipeline_mode = #tpu.pipeline_mode<synchronous>, transform_indices = @transform_16, window_bounds = array<i64: 1, 128>}, {transform_indices = @transform_17, window_bounds = array<i64: 8, 128>}]} {
    %c0_i32 = arith.constant 0 : i32
    %0 = arith.cmpi eq, %arg1, %c0_i32 : i32
    %1 = arith.extui %0 : i1 to i32
    %c0_i32_0 = arith.constant 0 : i32
    %2 = arith.cmpi ne, %1, %c0_i32_0 : i32
    scf.if %2 {
      %c0_58 = arith.constant 0 : index
      %c0_59 = arith.constant 0 : index
      %104 = vector.load %arg2[%c0_58, %c0_59] : memref<8x16xf32, #tpu.memory_space<vmem>>, vector<8x16xf32>
      %105 = arith.truncf %104 : vector<8x16xf32> to vector<8x16xbf16>
      %c0_60 = arith.constant 0 : index
      %c0_61 = arith.constant 0 : index
      %106 = vector.load %arg3[%c0_60, %c0_61] : memref<16x32xbf16, #tpu.memory_space<vmem>>, vector<16x32xbf16>
      %cst_62 = arith.constant dense<0.000000e+00> : vector<8x32xf32>
      %107 = tpu.matmul %105, %106, %cst_62 {dimension_numbers = #tpu.dot_dimension_numbers<[1], [0], [0], [1], [0, 0, 1, 1], [], []>} : vector<8x16xbf16>, vector<16x32xbf16>, vector<8x32xf32> -> vector<8x32xf32>
      %c0_63 = arith.constant 0 : index
      %c0_64 = arith.constant 0 : index
      %108 = vector.load %arg4[%c0_63, %c0_64] : memref<1x32xf32, #tpu.memory_space<vmem>>, vector<1x32xf32>
      %109 = vector.broadcast %108 : vector<1x32xf32> to vector<8x32xf32>
      %110 = arith.addf %107, %109 : vector<8x32xf32>
      %c0_65 = arith.constant 0 : index
      %c0_66 = arith.constant 0 : index
      %111 = vector.load %arg20[%c0_65, %c0_66] : memref<8x32xf32, #tpu.memory_space<vmem>>, vector<8x32xf32>
      tpu.vector_store %arg20[%c0_65, %c0_66], %110 {strides = array<i32>} : memref<8x32xf32, #tpu.memory_space<vmem>>, vector<8x32xf32>,
    } else {
    }
    %c0 = arith.constant 0 : index
    %c0_1 = arith.constant 0 : index
    %3 = vector.load %arg20[%c0, %c0_1] : memref<8x32xf32, #tpu.memory_space<vmem>>, vector<8x32xf32>
    %c0_2 = arith.constant 0 : index
    %c0_3 = arith.constant 0 : index
    %c0_4 = arith.constant 0 : index
    %4 = vector.load %arg9[%c0_2, %c0_3, %c0_4] : memref<1x1x32xf32, #tpu.memory_space<vmem>>, vector<1x1x32xf32>
    %5 = vector.shape_cast %4 : vector<1x1x32xf32> to vector<1x32xf32>
    %c0_5 = arith.constant 0 : index
    %c0_6 = arith.constant 0 : index
    %c0_7 = arith.constant 0 : index
    %6 = vector.load %arg10[%c0_5, %c0_6, %c0_7] : memref<1x1x32xf32, #tpu.memory_space<vmem>>, vector<1x1x32xf32>
    %7 = vector.shape_cast %6 : vector<1x1x32xf32> to vector<1x32xf32>
    %cst = arith.constant dense<0.000000e+00> : vector<8xf32>
    %8 = vector.multi_reduction <add>, %3, %cst [1] : vector<8x32xf32> to vector<8xf32>
    %9 = vector.shape_cast %8 : vector<8xf32> to vector<8x1xf32>
    %cst_8 = arith.constant 3.200000e+01 : f32
    %10 = vector.broadcast %cst_8 : f32 to vector<8x1xf32>
    %11 = arith.divf %9, %10 : vector<8x1xf32>
    %12 = vector.broadcast %11 : vector<8x1xf32> to vector<8x32xf32>
    %13 = arith.subf %3, %12 : vector<8x32xf32>
    %14 = arith.mulf %13, %13 : vector<8x32xf32>
    %cst_9 = arith.constant dense<0.000000e+00> : vector<8xf32>
    %15 = vector.multi_reduction <add>, %14, %cst_9 [1] : vector<8x32xf32> to vector<8xf32>
    %16 = vector.shape_cast %15 : vector<8xf32> to vector<8x1xf32>
    %cst_10 = arith.constant 3.200000e+01 : f32
    %17 = vector.broadcast %cst_10 : f32 to vector<8x1xf32>
    %18 = arith.divf %16, %17 : vector<8x1xf32>
    %cst_11 = arith.constant 9.99999974E-6 : f32
    %19 = vector.broadcast %cst_11 : f32 to vector<8x1xf32>
    %20 = arith.addf %18, %19 : vector<8x1xf32>
    %21 = math.rsqrt %20 : vector<8x1xf32>
    %22 = vector.broadcast %21 : vector<8x1xf32> to vector<8x32xf32>
    %23 = vector.broadcast %5 : vector<1x32xf32> to vector<8x32xf32>
    %24 = arith.mulf %22, %23 : vector<8x32xf32>
    %25 = arith.mulf %13, %24 : vector<8x32xf32>
    %26 = vector.broadcast %7 : vector<1x32xf32> to vector<8x32xf32>
    %27 = arith.addf %25, %26 : vector<8x32xf32>
    %28 = arith.truncf %27 : vector<8x32xf32> to vector<8x32xbf16>
    %c0_12 = arith.constant 0 : index
    %c0_13 = arith.constant 0 : index
    %c0_14 = arith.constant 0 : index
    %29 = vector.load %arg5[%c0_12, %c0_13, %c0_14] : memref<1x32x32xbf16, #tpu.memory_space<vmem>>, vector<1x32x32xbf16>
    %30 = vector.shape_cast %29 : vector<1x32x32xbf16> to vector<32x32xbf16>
    %cst_15 = arith.constant dense<0.000000e+00> : vector<8x32xf32>
    %31 = tpu.matmul %28, %30, %cst_15 {dimension_numbers = #tpu.dot_dimension_numbers<[1], [0], [0], [1], [0, 0, 1, 1], [], []>} : vector<8x32xbf16>, vector<32x32xbf16>, vector<8x32xf32> -> vector<8x32xf32>
    %c0_16 = arith.constant 0 : index
    %c0_17 = arith.constant 0 : index
    %c0_18 = arith.constant 0 : index
    %32 = vector.load %arg6[%c0_16, %c0_17, %c0_18] : memref<1x1x32xf32, #tpu.memory_space<vmem>>, vector<1x1x32xf32>
    %33 = vector.shape_cast %32 : vector<1x1x32xf32> to vector<1x32xf32>
    %34 = vector.broadcast %33 : vector<1x32xf32> to vector<8x32xf32>
    %35 = arith.addf %31, %34 : vector<8x32xf32>
    %36 = arith.truncf %35 : vector<8x32xf32> to vector<8x32xbf16>
    %c0_19 = arith.constant 0 : index
    %c0_20 = arith.constant 0 : index
    %c0_21 = arith.constant 0 : index
    %37 = vector.load %arg7[%c0_19, %c0_20, %c0_21] : memref<1x32x32xbf16, #tpu.memory_space<vmem>>, vector<1x32x32xbf16>
    %38 = vector.shape_cast %37 : vector<1x32x32xbf16> to vector<32x32xbf16>
    %cst_22 = arith.constant dense<0.000000e+00> : vector<8x32xf32>
    %39 = tpu.matmul %36, %38, %cst_22 {dimension_numbers = #tpu.dot_dimension_numbers<[1], [0], [0], [1], [0, 0, 1, 1], [], []>} : vector<8x32xbf16>, vector<32x32xbf16>, vector<8x32xf32> -> vector<8x32xf32>
    %c0_23 = arith.constant 0 : index
    %c0_24 = arith.constant 0 : index
    %c0_25 = arith.constant 0 : index
    %40 = vector.load %arg8[%c0_23, %c0_24, %c0_25] : memref<1x1x32xf32, #tpu.memory_space<vmem>>, vector<1x1x32xf32>
    %41 = vector.shape_cast %40 : vector<1x1x32xf32> to vector<1x32xf32>
    %42 = vector.broadcast %41 : vector<1x32xf32> to vector<8x32xf32>
    %43 = arith.addf %39, %42 : vector<8x32xf32>
    %44 = arith.addf %3, %43 : vector<8x32xf32>
    %c0_26 = arith.constant 0 : index
    %c0_27 = arith.constant 0 : index
    %c0_28 = arith.constant 0 : index
    %45 = vector.load %arg11[%c0_26, %c0_27, %c0_28] : memref<1x1x32xf32, #tpu.memory_space<vmem>>, vector<1x1x32xf32>
    %46 = vector.shape_cast %45 : vector<1x1x32xf32> to vector<1x32xf32>
    %c0_29 = arith.constant 0 : index
    %c0_30 = arith.constant 0 : index
    %c0_31 = arith.constant 0 : index
    %47 = vector.load %arg12[%c0_29, %c0_30, %c0_31] : memref<1x1x32xf32, #tpu.memory_space<vmem>>, vector<1x1x32xf32>
    %48 = vector.shape_cast %47 : vector<1x1x32xf32> to vector<1x32xf32>
    %cst_32 = arith.constant dense<0.000000e+00> : vector<8xf32>
    %49 = vector.multi_reduction <add>, %44, %cst_32 [1] : vector<8x32xf32> to vector<8xf32>
    %50 = vector.shape_cast %49 : vector<8xf32> to vector<8x1xf32>
    %cst_33 = arith.constant 3.200000e+01 : f32
    %51 = vector.broadcast %cst_33 : f32 to vector<8x1xf32>
    %52 = arith.divf %50, %51 : vector<8x1xf32>
    %53 = vector.broadcast %52 : vector<8x1xf32> to vector<8x32xf32>
    %54 = arith.subf %44, %53 : vector<8x32xf32>
    %55 = arith.mulf %54, %54 : vector<8x32xf32>
    %cst_34 = arith.constant dense<0.000000e+00> : vector<8xf32>
    %56 = vector.multi_reduction <add>, %55, %cst_34 [1] : vector<8x32xf32> to vector<8xf32>
    %57 = vector.shape_cast %56 : vector<8xf32> to vector<8x1xf32>
    %cst_35 = arith.constant 3.200000e+01 : f32
    %58 = vector.broadcast %cst_35 : f32 to vector<8x1xf32>
    %59 = arith.divf %57, %58 : vector<8x1xf32>
    %cst_36 = arith.constant 9.99999974E-6 : f32
    %60 = vector.broadcast %cst_36 : f32 to vector<8x1xf32>
    %61 = arith.addf %59, %60 : vector<8x1xf32>
    %62 = math.rsqrt %61 : vector<8x1xf32>
    %63 = vector.broadcast %62 : vector<8x1xf32> to vector<8x32xf32>
    %64 = vector.broadcast %46 : vector<1x32xf32> to vector<8x32xf32>
    %65 = arith.mulf %63, %64 : vector<8x32xf32>
    %66 = arith.mulf %54, %65 : vector<8x32xf32>
    %67 = vector.broadcast %48 : vector<1x32xf32> to vector<8x32xf32>
    %68 = arith.addf %66, %67 : vector<8x32xf32>
    %69 = arith.truncf %68 : vector<8x32xf32> to vector<8x32xbf16>
    %c0_37 = arith.constant 0 : index
    %c0_38 = arith.constant 0 : index
    %c0_39 = arith.constant 0 : index
    %70 = vector.load %arg13[%c0_37, %c0_38, %c0_39] : memref<1x32x64xbf16, #tpu.memory_space<vmem>>, vector<1x32x64xbf16>
    %71 = vector.shape_cast %70 : vector<1x32x64xbf16> to vector<32x64xbf16>
    %cst_40 = arith.constant dense<0.000000e+00> : vector<8x64xf32>
    %72 = tpu.matmul %69, %71, %cst_40 {dimension_numbers = #tpu.dot_dimension_numbers<[1], [0], [0], [1], [0, 0, 1, 1], [], []>} : vector<8x32xbf16>, vector<32x64xbf16>, vector<8x64xf32> -> vector<8x64xf32>
    %73 = arith.truncf %72 : vector<8x64xf32> to vector<8x64xbf16>
    %c0_41 = arith.constant 0 : index
    %c0_42 = arith.constant 0 : index
    %c0_43 = arith.constant 0 : index
    %74 = vector.load %arg14[%c0_41, %c0_42, %c0_43] : memref<1x1x64xf32, #tpu.memory_space<vmem>>, vector<1x1x64xf32>
    %75 = vector.shape_cast %74 : vector<1x1x64xf32> to vector<1x64xf32>
    %76 = arith.truncf %75 : vector<1x64xf32> to vector<1x64xbf16>
    %77 = vector.broadcast %76 : vector<1x64xbf16> to vector<8x64xbf16>
    %78 = arith.addf %73, %77 : vector<8x64xbf16>
    %79 = arith.mulf %78, %78 : vector<8x64xbf16>
    %80 = arith.mulf %78, %79 : vector<8x64xbf16>
    %cst_44 = arith.constant 4.467770e-02 : bf16
    %81 = vector.broadcast %cst_44 : bf16 to vector<8x64xbf16>
    %82 = arith.mulf %81, %80 : vector<8x64xbf16>
    %83 = arith.addf %78, %82 : vector<8x64xbf16>
    %cst_45 = arith.constant 7.968750e-01 : bf16
    %84 = vector.broadcast %cst_45 : bf16 to vector<8x64xbf16>
    %85 = arith.mulf %84, %83 : vector<8x64xbf16>
    %86 = math.tanh %85 : vector<8x64xbf16>
    %cst_46 = arith.constant 1.000000e+00 : bf16
    %87 = vector.broadcast %cst_46 : bf16 to vector<8x64xbf16>
    %88 = arith.addf %87, %86 : vector<8x64xbf16>
    %cst_47 = arith.constant 5.000000e-01 : bf16
    %89 = vector.broadcast %cst_47 : bf16 to vector<8x64xbf16>
    %90 = arith.mulf %89, %88 : vector<8x64xbf16>
    %91 = arith.mulf %78, %90 : vector<8x64xbf16>
    %c0_48 = arith.constant 0 : index
    %c0_49 = arith.constant 0 : index
    %c0_50 = arith.constant 0 : index
    %92 = vector.load %arg15[%c0_48, %c0_49, %c0_50] : memref<1x64x32xbf16, #tpu.memory_space<vmem>>, vector<1x64x32xbf16>
    %93 = vector.shape_cast %92 : vector<1x64x32xbf16> to vector<64x32xbf16>
    %cst_51 = arith.constant dense<0.000000e+00> : vector<8x32xf32>
    %94 = tpu.matmul %91, %93, %cst_51 {dimension_numbers = #tpu.dot_dimension_numbers<[1], [0], [0], [1], [0, 0, 1, 1], [], []>} : vector<8x64xbf16>, vector<64x32xbf16>, vector<8x32xf32> -> vector<8x32xf32>
    %c0_52 = arith.constant 0 : index
    %c0_53 = arith.constant 0 : index
    %c0_54 = arith.constant 0 : index
    %95 = vector.load %arg16[%c0_52, %c0_53, %c0_54] : memref<1x1x32xf32, #tpu.memory_space<vmem>>, vector<1x1x32xf32>
    %96 = vector.shape_cast %95 : vector<1x1x32xf32> to vector<1x32xf32>
    %97 = vector.broadcast %96 : vector<1x32xf32> to vector<8x32xf32>
    %98 = arith.addf %94, %97 : vector<8x32xf32>
    %99 = arith.addf %44, %98 : vector<8x32xf32>
    %c0_55 = arith.constant 0 : index
    %c0_56 = arith.constant 0 : index
    %100 = vector.load %arg20[%c0_55, %c0_56] : memref<8x32xf32, #tpu.memory_space<vmem>>, vector<8x32xf32>
    tpu.vector_store %arg20[%c0_55, %c0_56], %99 {strides = array<i32>} : memref<8x32xf32, #tpu.memory_space<vmem>>, vector<8x32xf32>,
    %c1_i32 = arith.constant 1 : i32
    %101 = arith.cmpi eq, %arg1, %c1_i32 : i32
    %102 = arith.extui %101 : i1 to i32
    %c0_i32_57 = arith.constant 0 : i32
    %103 = arith.cmpi ne, %102, %c0_i32_57 : i32
    scf.if %103 {
      %104 = arith.truncf %99 : vector<8x32xf32> to vector<8x32xbf16>
      %c0_58 = arith.constant 0 : index
      %c0_59 = arith.constant 0 : index
      %105 = vector.load %arg17[%c0_58, %c0_59] : memref<32x128xbf16, #tpu.memory_space<vmem>>, vector<32x128xbf16>
      %cst_60 = arith.constant dense<0.000000e+00> : vector<8x128xf32>
      %106 = tpu.matmul %104, %105, %cst_60 {dimension_numbers = #tpu.dot_dimension_numbers<[1], [0], [0], [1], [0, 0, 1, 1], [], []>} : vector<8x32xbf16>, vector<32x128xbf16>, vector<8x128xf32> -> vector<8x128xf32>
      %c0_61 = arith.constant 0 : index
      %c0_62 = arith.constant 0 : index
      %107 = vector.load %arg18[%c0_61, %c0_62] : memref<1x128xf32, #tpu.memory_space<vmem>>, vector<1x128xf32>
      %108 = vector.broadcast %107 : vector<1x128xf32> to vector<8x128xf32>
      %109 = arith.addf %106, %108 : vector<8x128xf32>
      %c0_63 = arith.constant 0 : index
      %c0_64 = arith.constant 0 : index
      %110 = vector.load %arg19[%c0_63, %c0_64] : memref<8x128xf32, #tpu.memory_space<vmem>>, vector<8x128xf32>
      tpu.vector_store %arg19[%c0_63, %c0_64], %109 {strides = array<i32>} : memref<8x128xf32, #tpu.memory_space<vmem>>, vector<8x128xf32>,
    } else {
    }
    return
  }
  func.func @transform_0(%arg0: i32, %arg1: i32) -> (i32, i32) {
    %c0_i32 = arith.constant 0 : i32
    %c0_i32_0 = arith.constant 0 : i32
    return %arg0, %c0_i32 : i32, i32
  }
  func.func @transform_1(%arg0: i32, %arg1: i32) -> (i32, i32) {
    %c0_i32 = arith.constant 0 : i32
    %c0_i32_0 = arith.constant 0 : i32
    %c0_i32_1 = arith.constant 0 : i32
    return %c0_i32, %c0_i32_0 : i32, i32
  }
  func.func @transform_2(%arg0: i32, %arg1: i32) -> (i32, i32) {
    %c0_i32 = arith.constant 0 : i32
    %c0_i32_0 = arith.constant 0 : i32
    %c0_i32_1 = arith.constant 0 : i32
    return %c0_i32, %c0_i32_0 : i32, i32
  }
  func.func @transform_3(%arg0: i32, %arg1: i32) -> (i32, i32, i32) {
    %c0_i32 = arith.constant 0 : i32
    %c0_i32_0 = arith.constant 0 : i32
    %c0_i32_1 = arith.constant 0 : i32
    return %arg1, %c0_i32, %c0_i32_0 : i32, i32, i32
  }
  func.func @transform_4(%arg0: i32, %arg1: i32) -> (i32, i32, i32) {
    %c0_i32 = arith.constant 0 : i32
    %c0_i32_0 = arith.constant 0 : i32
    %c0_i32_1 = arith.constant 0 : i32
    return %arg1, %c0_i32, %c0_i32_0 : i32, i32, i32
  }
  func.func @transform_5(%arg0: i32, %arg1: i32) -> (i32, i32, i32) {
    %c0_i32 = arith.constant 0 : i32
    %c0_i32_0 = arith.constant 0 : i32
    %c0_i32_1 = arith.constant 0 : i32
    return %arg1, %c0_i32, %c0_i32_0 : i32, i32, i32
  }
  func.func @transform_6(%arg0: i32, %arg1: i32) -> (i32, i32, i32) {
    %c0_i32 = arith.constant 0 : i32
    %c0_i32_0 = arith.constant 0 : i32
    %c0_i32_1 = arith.constant 0 : i32
    return %arg1, %c0_i32, %c0_i32_0 : i32, i32, i32
  }
  func.func @transform_7(%arg0: i32, %arg1: i32) -> (i32, i32, i32) {
    %c0_i32 = arith.constant 0 : i32
    %c0_i32_0 = arith.constant 0 : i32
    %c0_i32_1 = arith.constant 0 : i32
    return %arg1, %c0_i32, %c0_i32_0 : i32, i32, i32
  }
  func.func @transform_8(%arg0: i32, %arg1: i32) -> (i32, i32, i32) {
    %c0_i32 = arith.constant 0 : i32
    %c0_i32_0 = arith.constant 0 : i32
    %c0_i32_1 = arith.constant 0 : i32
    return %arg1, %c0_i32, %c0_i32_0 : i32, i32, i32
  }
  func.func @transform_9(%arg0: i32, %arg1: i32) -> (i32, i32, i32) {
    %c0_i32 = arith.constant 0 : i32
    %c0_i32_0 = arith.constant 0 : i32
    %c0_i32_1 = arith.constant 0 : i32
    return %arg1, %c0_i32, %c0_i32_0 : i32, i32, i32
  }
  func.func @transform_10(%arg0: i32, %arg1: i32) -> (i32, i32, i32) {
    %c0_i32 = arith.constant 0 : i32
    %c0_i32_0 = arith.constant 0 : i32
    %c0_i32_1 = arith.constant 0 : i32
    return %arg1, %c0_i32, %c0_i32_0 : i32, i32, i32
  }
  func.func @transform_11(%arg0: i32, %arg1: i32) -> (i32, i32, i32) {
    %c0_i32 = arith.constant 0 : i32
    %c0_i32_0 = arith.constant 0 : i32
    %c0_i32_1 = arith.constant 0 : i32
    return %arg1, %c0_i32, %c0_i32_0 : i32, i32, i32
  }
  func.func @transform_12(%arg0: i32, %arg1: i32) -> (i32, i32, i32) {
    %c0_i32 = arith.constant 0 : i32
    %c0_i32_0 = arith.constant 0 : i32
    %c0_i32_1 = arith.constant 0 : i32
    return %arg1, %c0_i32, %c0_i32_0 : i32, i32, i32
  }
  func.func @transform_13(%arg0: i32, %arg1: i32) -> (i32, i32, i32) {
    %c0_i32 = arith.constant 0 : i32
    %c0_i32_0 = arith.constant 0 : i32
    %c0_i32_1 = arith.constant 0 : i32
    return %arg1, %c0_i32, %c0_i32_0 : i32, i32, i32
  }
  func.func @transform_14(%arg0: i32, %arg1: i32) -> (i32, i32, i32) {
    %c0_i32 = arith.constant 0 : i32
    %c0_i32_0 = arith.constant 0 : i32
    %c0_i32_1 = arith.constant 0 : i32
    return %arg1, %c0_i32, %c0_i32_0 : i32, i32, i32
  }
  func.func @transform_15(%arg0: i32, %arg1: i32) -> (i32, i32) {
    %c0_i32 = arith.constant 0 : i32
    %c0_i32_0 = arith.constant 0 : i32
    %c0_i32_1 = arith.constant 0 : i32
    return %c0_i32, %c0_i32_0 : i32, i32
  }
  func.func @transform_16(%arg0: i32, %arg1: i32) -> (i32, i32) {
    %c0_i32 = arith.constant 0 : i32
    %c0_i32_0 = arith.constant 0 : i32
    %c0_i32_1 = arith.constant 0 : i32
    return %c0_i32, %c0_i32_0 : i32, i32
  }
  func.func @transform_17(%arg0: i32, %arg1: i32) -> (i32, i32) {
    %c0_i32 = arith.constant 0 : i32
    %c0_i32_0 = arith.constant 0 : i32
    return %arg0, %c0_i32 : i32, i32
  }
}

</mosaic_0001>

<bundles_post_ra>
// kernel: tpu_custom_call.1
= control target key start
LH: loop header
LB: loop body
LE: loop exit
PB: predicated region body
PF: predicated region fallthrough
CT: control target
= control target key end

     0   :  { %s2212_s0 = inlined_call_operand.hbm [shape: f32[8,16], index: 0, kind: input, shape index: {}]   ;;  %s2213_s1 = inlined_call_operand.hbm [shape: bf16[16,32], index: 1, kind: input, shape index: {}]   ;;  %s2214_s2 = inlined_call_operand.vmem [shape: f32[1,32], index: 2, kind: input, shape index: {}]   ;;  %s2215_s3 = inlined_call_operand.vmem [shape: bf16[2,32,32], index: 3, kind: input, shape index: {}]   ;;  %s2216_s4 = inlined_call_operand.vmem [shape: f32[2,1,32], index: 4, kind: input, shape index: {}]   ;;  %s2217_s5 = inlined_call_operand.vmem [shape: bf16[2,32,32], index: 5, kind: input, shape index: {}]   ;;  %s2218_s6 = inlined_call_operand.vmem [shape: f32[2,1,32], index: 6, kind: input, shape index: {}]   ;;  %s2219_s7 = inlined_call_operand.hbm [shape: f32[2,1,32], index: 7, kind: input, shape index: {}]   ;;  %s2220_s8 = inlined_call_operand.vmem [shape: f32[2,1,32], index: 8, kind: input, shape index: {}]   ;;  %s2221_s9 = inlined_call_operand.hbm [shape: f32[2,1,32], index: 9, kind: input, shape index: {}]   ;;  %s2222_s10 = inlined_call_operand.vmem [shape: f32[2,1,32], index: 10, kind: input, shape index: {}]   ;;  %s2223_s11 = inlined_call_operand.vmem [shape: bf16[2,32,64], index: 11, kind: input, shape index: {}]   ;;  %s2224_s12 = inlined_call_operand.vmem [shape: f32[2,1,64], index: 12, kind: input, shape index: {}]   ;;  %s2225_s13 = inlined_call_operand.vmem [shape: bf16[2,64,32], index: 13, kind: input, shape index: {}]   ;;  %s2226_s14 = inlined_call_operand.vmem [shape: f32[2,1,32], index: 14, kind: input, shape index: {}]   ;;  %s2227_s15 = inlined_call_operand.hbm [shape: bf16[32,128], index: 15, kind: input, shape index: {}]   ;;  %s2228_s16 = inlined_call_operand.vmem [shape: f32[1,128], index: 16, kind: input, shape index: {}]   ;;  %s2229_s17 = inlined_call_operand.hbm [shape: f32[8,128], index: 17, kind: output, shape index: {}]  }
   0x1   :  { %2237 = sst [smem:[#allocation23_spill]] %s2212_s0 }
   0x2   :  { %2238 = sst [smem:[#allocation24_spill]] %s2213_s1 }
   0x3   :  { %2239 = sst [smem:[#allocation25_spill]] %s2214_s2 }
   0x4   :  { %2240 = sst [smem:[#allocation26_spill]] %s2215_s3 }
   0x5   :  { %2241 = sst [smem:[#allocation27_spill]] %s2217_s5 }
   0x6   :  { %2242 = sst [smem:[#allocation28_spill]] %s2219_s7 }
   0x7   :  { %2243 = sst [smem:[#allocation29_spill]] %s2221_s9 }
   0x8   :  { %2244 = sst [smem:[#allocation30_spill]] %s2222_s10 }
   0x9   :  { %2245 = sst [smem:[#allocation31_spill]] %s2223_s11 }
   0xa   :  { %2246 = sst [smem:[#allocation32_spill]] %s2224_s12 }
   0xb   :  { %2247 = sst [smem:[#allocation33_spill]] %s2225_s13 }
   0xc   :  { %2248 = sst [smem:[#allocation34_spill]] %s2226_s14 }
   0xd   :  { %2249 = sst [smem:[#allocation35_spill]] %s2227_s15 }
   0xe   :  { %2250 = sst [smem:[#allocation36_spill]] %s2228_s16 }
   0xf   :  { %2251 = sst [smem:[#allocation37_spill]] %s2229_s17 }
  0x10   :  { %22 = vsyncpa [#allocation4], 0 }
  0x11   :  { %23 = vsyncpa [#allocation7], 0 }
  0x12   :  { %24 = vsyncpa [#allocation5], 0  ;;  %s1945_s24 = smov 0   ;;  %s1947_s25 = smov 0  }
  0x13   :  { %s1949_s26 = smov 0   ;;  %s1951_s27 = smov 0  }
  0x14   :  { %s1953_s28 = smov 0   ;;  %s1955_s29 = smov 0  }
  0x15 LB: > { %2252 = sst [smem:[#allocation17_spill]] %s1830_s25  ;;  %s1974_s0 = sadd.s32 4294967295, %s1846_s29   ;;  %s1846_s29 = sphi %s1955_s29, %s30_s29   ;;  %s1842_s28 = sphi %s1953_s28, %s2290_s28   ;;  %s1838_s27 = sphi %s1951_s27, %s2289_s27   ;;  %s1834_s26 = sphi %s1949_s26, %s2288_s26   ;;  %s1830_s25 = sphi %s1947_s25, %s2287_s25   ;;  %s1826_s24 = sphi %s1945_s24, %s2286_s24  }
  0x16   : > { %2253 = sst [smem:[#allocation18_spill]] %s1834_s26  ;;  %p234_p0 = scmp.ne.s32.totalorder %s1830_s25, %s1826_s24 }
  0x17   : > { %2254 = sst [smem:[#allocation19_spill]] %s1842_s28  ;;  %p235_p1 = scmp.eq.s32.totalorder %s1974_s0, 0 }
  0x18   : > { %2255 = sst [smem:[#allocation20_spill]] %s1846_s29  ;;  %p1386_p2 = scmp.ge.s32.totalorder %s1846_s29, 1 }
  0x19   : > { %p495_p3 = scmp.lt.s32.totalorder %s1846_s29, 3  ;;  %p1982_p4 = por %p235_p1, %p234_p0 }
  0x1a   : > { %s2257_s1 = sld [smem:[#allocation23_spill]]  ;;  %s1848_s22 = smov [#allocation3]  }
  0x1b   : > { %p1989_p5 = pnand %p1386_p2, %p495_p3  ;;  %s511_s23 = sshll.u32 %s1848_s22, 4  ;;  %s512_s23 = int_to_ptr.vmem [resolvable:$true] %s511_s23 }
  0x1c   : > { %s2259_s18 = sld [smem:[#allocation24_spill]]  ;;  %s1849_s16 = smov [#allocation6]  }
  0x1d   : > { %p1504_p6 = pneg %p1989_p5  ;;  %s522_s2 = sshll.u32 %s1849_s16, 4  ;;  %s523_s2 = int_to_ptr.vmem [resolvable:$true] %s522_s2 }
  0x1e   : > { %s2230_s17 = smov 64   ;;  %s2231_s22 = smov 4  }
  0x1f   : > { %p2000_p7 = pnand %p1504_p6, %p235_p1  ;;  %s39_s24 = sadd.s32 1, %s1842_s28 }
  0x20   : > { %s509_s20 = sshll.u32 %s2257_s1, 4  ;;  %p40_p8 = scmp.ge.s32.totalorder %s39_s24, 2  ;;  %s510_s20 = int_to_ptr.hbm [resolvable:$true] %s509_s20 }
  0x21   : > { %1507 = dma.hbm_to_vmem [thread:$0]  (!%p2000_p7), %s510_s20, 128, %s512_s23, [#allocation4]  }
  0x22   : > { %s520_s19 = sshll.u32 %s2259_s18, 4  ;;  %s221_s18 = sadd.s32 1, %s1834_s26  ;;  %s521_s19 = int_to_ptr.hbm [resolvable:$true] %s520_s19 }
  0x23   : > { %1510 = dma.hbm_to_vmem [thread:$0]  (!%p2000_p7), %s521_s19, 128, %s523_s2, [#allocation7], %s2230_s17, %s2230_s17, %s2231_s22  }
  0x24   : > { %p228_p9 = scmp.ne.s32.totalorder %s1834_s26, %s1830_s25  ;;  %p229_p10 = scmp.eq.s32.totalorder %s1846_s29, 0 }
  0x25   : > { %p1524_p11 = scmp.lt.s32.totalorder %s1846_s29, 2  ;;  %s2292_s24 = smov (%p40_p8, %s39_s24), 0 }
  0x26   : > { %2261 = sst [smem:[#allocation21_spill]] %s2292_s24  ;;  %p230_p12 = por %p229_p10, %p228_p9 }
  0x27   : > { %s584_s16 = sand.u32 1, %s1846_s29   ;;  %s218_s20 = ssub.s32 %s1842_s28, %s2292_s24 }
  0x28   : > { %p219_p13 = scmp.eq.s32.totalorder %s218_s20, 0  ;;  %s586_s23 = sand.u32 1, %s1834_s26  }
  0x29   : > { %s2262_s7 = sld [smem:[#allocation28_spill]]  ;;  %s587_s22 = scalar_lea.vmem [#allocation8], %s586_s23 }
  0x2a   : > { %s2028_s19 = scalar_select %p219_p13, %s1834_s26, %s221_s18  }
  0x2b   : > { %s594_s12 = sshll.u32 %s587_s22, 4  ;;  %p2032_p0 = pnand %p1524_p11, %p230_p12  ;;  %s595_s12 = int_to_ptr.vmem [resolvable:$true] %s594_s12 }
  0x2c   : > { %2263 = sst [smem:[#allocation22_spill]] %s2028_s19  ;;  %s1852_s14 = smov [#allocation10]  }
  0x2d   : > { %s2265_s15 = sld [smem:[#allocation35_spill]]  ;;  %s539_s18 = sshll.u32 %s1852_s14, 4  ;;  %s540_s18 = int_to_ptr.vmem [resolvable:$true] %s539_s18 }
  0x2e   : > { %s2266_s22 = smov 4   ;;  %s2268_s9 = sld [smem:[#allocation29_spill]] }
  0x2f   : > { %s590_s2 = scalar_lea.hbm %s2262_s7, %s1842_s28  ;;  %s585_s7 = scalar_lea.sflag [#allocation4], %s584_s16 }
  0x30   : > { %s592_s17 = sshll.u32 %s590_s2, 4  ;;  %s2267_s2 = smov 64   ;;  %s593_s17 = int_to_ptr.hbm [resolvable:$true] %s592_s17 }
  0x31   : > { %1517 = dma.hbm_to_vmem [thread:$0]  (!%p2032_p0), %s593_s17, 16, %s595_s12, %s585_s7  }
  0x32   : > { %s610_s24 = scalar_lea.vmem [#allocation9], %s586_s23 }
  0x33   : > { %s537_s13 = sshll.u32 %s2265_s15, 4  ;;  %s617_s20 = sshll.u32 %s610_s24, 4  ;;  %s538_s13 = int_to_ptr.hbm [resolvable:$true] %s537_s13  ;;  %s618_s20 = int_to_ptr.vmem [resolvable:$true] %s617_s20 }
  0x34   : > { %1513 = dma.hbm_to_vmem [thread:$0]  (!%p2000_p7), %s538_s13, 256, %s540_s18, [#allocation7], %s2267_s2, %s2267_s2, %s2266_s22  }
  0x35   : > { %s613_s29 = scalar_lea.hbm %s2268_s9, %s1842_s28  ;;  %660 = sbr.rel (%p1989_p5) target bundleno = 1512 (0x5e8), region = 88 }
  0x36   : > { %s615_s10 = sshll.u32 %s613_s29, 4  ;;  %s616_s10 = int_to_ptr.hbm [resolvable:$true] %s615_s10 }
  0x37   : > { %1520 = dma.hbm_to_vmem [thread:$0]  (!%p2032_p0), %s616_s10, 16, %s618_s20, %s585_s7  }
  0x3a   : > { %1805 = dma.done.wait (%p235_p1), [#allocation4], 128  }
  0x3b   : > { %1807 = vsyncadd (%p235_p1), [#allocation4], 4294967168 }
  0x3c   : > { %1809 = dma.done.wait (%p235_p1), [#allocation7], 128  }
  0x3d   : > { %1811 = vsyncadd (%p235_p1), [#allocation7], 4294967168  ;;  %s672_s11 = sand.u32 1, %s1974_s0   ;;  %s674_s7 = sand.u32 1, %s1830_s25  }
  0x3e   : > { %s673_s10 = scalar_lea.sflag [#allocation4], %s672_s11  ;;  %s2064_s12 = scalar_lea.vmem [#allocation8], %s674_s7 }
  0x3f   : > { %1813 = dma.done.wait (%p1982_p4), %s673_s10, 32  }
  0x40   : > { %1815 = vsyncadd (%p1982_p4), %s673_s10, 4294967264  ;;  %s2070_s26 = scalar_lea.vmem [#allocation9], %s674_s7 }
  0x41   : > { %1817 = dma.done.wait (%p235_p1), [#allocation7], 256  }
  0x42   : > { %1819 = vsyncadd (%p235_p1), [#allocation7], 4294967040  ;;  %p777_p2 = scmp.lt.s32.totalorder %s1838_s27, 1  ;;  %s2269_s3 = sld [smem:[#allocation26_spill]] }
  0x43   : > { %s2270_s5 = sld [smem:[#allocation27_spill]]  ;;  %p1403_p1 = scmp.ne.s32.totalorder %s1838_s27, 0 }
  0x44   : > { %s2078_s29 = scalar_select %p777_p2, %s1838_s27, 1 }
  0x45   : > { %s2271_s1 = sld [smem:[#allocation30_spill]] }
  0x46   : > { %s1467_s30 = sshll.u32 %s2078_s29, 4  ;;  %s1470_s28 = sshll.u32 %s2078_s29, 5 }
  0x47   : > { %s2274_s24 = sld [smem:[#allocation33_spill]] }
  0x48   : > { %s2088_s19 = scalar_lea.vmem %s2269_s3, %s1467_s30  ;;  %s2272_s3 = sld [smem:[#allocation31_spill]] }
  0x49   : > { %s2093_s18 = scalar_lea.vmem %s2270_s5, %s1467_s30  ;;  %s2273_s5 = sld [smem:[#allocation32_spill]] }
  0x4a   : > { %s2275_s7 = sld [smem:[#allocation34_spill]] }
  0x4b   : > { %s798_s17 = scalar_lea.vmem %s2271_s1, %s2078_s29 }
  0x4c   : > { %819 = sbr.rel (%p1403_p1) target bundleno = 219 (0xdb), region = 112 }
  0x4d   : > { %s2120_s25 = scalar_lea.vmem %s2274_s24, %s1470_s28 }
  0x4e   : > { %s2110_s9 = scalar_lea.vmem %s2272_s3, %s1467_s30  ;;  %s2276_s30 = sld [smem:[#allocation25_spill]] (!%p1403_p1) }
  0x4f   : > { %s806_s15 = scalar_lea.vmem %s2273_s5, %s2078_s29 }
  0x50   : > { %s814_s10 = scalar_lea.vmem %s2275_s7, %s2078_s29 }
  0x51   : > { %v1471_v0 = vld [vmem:[#allocation6] sm:$0xff]  ;;  %v820_v1 = vld [vmem:[#allocation3] sm:$0xff]  ;;  %vm834_vm0 = vcmask 130048   ;;  %vm851_vm1 = vcmask 261120  }
  0x52   : > { %v821_v2 = vpack.c.bf16 %v820_v1, %v820_v1  ;;  %845 = vmatpush.bf16.msra.mxu0 %v1471_v0 }
  0x54   : > { %v1585_v3 = vld [vmem:[%s2276_s30] ss:$0 sm:$0xff] }
  0x55   : > { %1408 = vmatmul.msk.bf16.vlgmr.msra.gmra.mxu0 %vm834_vm0, %v821_v2 }
  0xd2   : > { %v847_v4 = vpop.f32.mrf.mxu0 }
  0xd3   : > { %v848_v5 = vadd.f32 %v1585_v3, %v847_v4 }
  0xd5   : > { %852 = vst.msk [vmem:[#allocation2] sm:$0xff] %vm851_vm1, %v848_v5 }
  0xda   : > { %v849_v6 = vpop.f32.mrf.mxu0 }
  0xdb PF: > { %vm856_vm2 = vcmask 261120   ;;  %v1853_v9 = vmov 32.0   ;;  %v1473_v21 = vld [vmem:[%s2088_s19 + $0x8] sm:$0xff]  ;;  %v1472_v22 = vld [vmem:[%s2088_s19] sm:$0xff]  ;;  %s2277_s24 = scalar_lea.vmem %s2220_s8, %s2078_s29  ;;  %s2278_s21 = scalar_lea.vmem %s2216_s4, %s2078_s29  ;;  %vm1108_vm10 = vcmask 523264  }
  0xdc   : > { %v853_v7 = vld [vmem:[#allocation2] sm:$0xff]  ;;  %1593 = vrcp.f32 %v1853_v9  ;;  %924 = vmatpush.bf16.msra.mxu0 %v1473_v21  ;;  %v1475_v23 = vld [vmem:[%s2093_s18 + $0x8] sm:$0xff]  ;;  %s2279_s23 = scalar_lea.vmem %s2218_s6, %s2078_s29  ;;  %p1453_p3 = scmp.ne.s32.totalorder %s1838_s27, 1 }
  0xdd   : > { %v857_v8 = vsel %vm856_vm2, %v853_v7, 0.0  ;;  %961 = vmatpush.bf16.msra.mxu1 %v1475_v23  ;;  %v1586_v32 = vld [vmem:[%s2064_s12] ss:$0 sm:$0xff]  ;;  %v1477_v57 = vld [vmem:[%s2110_s9 + $0x8] sm:$0xff]  ;;  %s2283_s20 = sld [smem:[#allocation36_spill]] (!%p1453_p3) }
  0xde   : > { %858 = vadd.xlane.f32.xlu0 %v857_v8  ;;  %v1587_v36 = vld [vmem:[%s2277_s24] ss:$0 sm:$0xff]  ;;  %1027 = vmatpush.bf16.msra.mxu2 %v1477_v57  ;;  %v1479_v23 = vld [vmem:[%s2120_s25 + $0x8] sm:$0xff] }
  0xdf   : > { %v1474_v40 = vld [vmem:[%s2093_s18] sm:$0xff] }
  0xe0   : > { %925 = vmatpush.bf16.msra.mxu0 %v1472_v22  ;;  %v1588_v41 = vld [vmem:[%s2278_s21] ss:$0 sm:$0xff] }
  0xe1   : > { %962 = vmatpush.bf16.msra.mxu1 %v1474_v40  ;;  %v1589_v46 = vld [vmem:[%s2279_s23] ss:$0 sm:$0xff] }
  0xe2   : > { %v1594_v10 = vpop.eup %1593  ;;  %v1476_v58 = vld [vmem:[%s2110_s9] sm:$0xff] }
  0xe3   : > { %v861_v11 = vmul.f32 32.0, %v1594_v10  ;;  %vm865_vm3 = vweird.f32 %v1594_v10  ;;  %1028 = vmatpush.bf16.msra.mxu2 %v1476_v58  ;;  %v1590_v3 = vld [vmem:[%s2070_s26] ss:$0 sm:$0xff] }
  0xe5   : > { %v862_v12 = vsub.f32 1.0, %v861_v11  ;;  %v1035_v11 = vld [vmem:[%s806_s15] sm:$0x1] }
  0xe7   : > { %v863_v13 = vmul.f32 %v1594_v10, %v862_v12  ;;  %v1036_v12 = vpack.c.bf16 %v1035_v11, %v1035_v11 }
  0xe9   : > { %v864_v14 = vadd.f32 %v1594_v10, %v863_v13  ;;  %v1038_v13 = vpack.i.b16 %v1036_v12, %v1036_v12 }
  0xeb   : > { %v866_v15 = vsel %vm865_vm3, %v1594_v10, %v864_v14  ;;  %v1040_v14 = vperm.slane %v1038_v13, 0 }
 0x151   : > { %v859_v16 = vpop.xlane.xlu0 %858 }
 0x152   : > { %v867_v17 = vmul.f32 %v866_v15, %v859_v16 }
 0x154   : > { %v868_v18 = vsub.f32 %v853_v7, %v867_v17  ;;  %v1042_v17 = vunpack.c.l.bf16 %v1040_v14 }
 0x156   : > { %v869_v19 = vmul.f32 %v868_v18, %v868_v18 }
 0x158   : > { %v870_v20 = vsel %vm856_vm2, %v869_v19, 0.0 }
 0x159   : > { %871 = vadd.xlane.f32.xlu0 %v870_v20  ;;  %v1480_v20 = vld [vmem:[%s2120_s25 + $0x10] sm:$0xff] }
 0x1cc   : > { %v872_v24 = vpop.xlane.xlu0 %871 }
 0x1cd   : > { %v873_v25 = vmul.f32 %v872_v24, %v866_v15 }
 0x1cf   : > { %v874_v26 = vadd.f32 1e-05, %v873_v25 }
 0x1d1   : > { %1595 = vrsqrt.f32 %v874_v26  ;;  %vm881_vm5 = vweird.f32 %v874_v26 }
 0x1d7   : > { %v1596_v27 = vpop.eup %1595 }
 0x1d8   : > { %v876_v28 = vmul.f32 %v1596_v27, %v874_v26  ;;  %vm882_vm4 = vweird.f32 %v1596_v27 }
 0x1d9   : > { %vm883_vm6 = vmor %vm881_vm5, %vm882_vm4 }
 0x1da   : > { %v877_v29 = vmul.f32 %v1596_v27, %v876_v28 }
 0x1dc   : > { %v878_v30 = vmul.f32 0.5, %v877_v29 }
 0x1de   : > { %v879_v31 = vsub.f32 1.5, %v878_v30 }
 0x1e0   : > { %v880_v33 = vmul.f32 %v1596_v27, %v879_v31 }
 0x1e2   : > { %v884_v34 = vsel %vm883_vm6, %v1596_v27, %v880_v33  ;;  %v1478_v27 = vld [vmem:[%s2120_s25] sm:$0xff] }
 0x1e3   : > { %v888_v35 = vmul.f32 %v1586_v32, %v884_v34 }
 0x1e5   : > { %v889_v37 = vmul.f32 %v888_v35, %v868_v18  ;;  %v1481_v18 = vld [vmem:[%s2120_s25 + $0x18] sm:$0xff] }
 0x1e6   : > { %1116 = vmatpush.bf16.msra.mxu3 %v1481_v18 }
 0x1e7   : > { %v893_v38 = vadd.f32 %v1587_v36, %v889_v37 }
 0x1e9   : > { %v894_v39 = vpack.c.bf16 %v893_v38, %v893_v38 }
 0x1ea   : > { %1117 = vmatpush.bf16.msra.mxu3 %v1480_v20 }
 0x1eb   : > { %1417 = vmatmul.msk.bf16.vlgmr.msra.gmra.mxu0 %vm856_vm2, %v894_v39 }
 0x1ee   : > { %1118 = vmatpush.bf16.msra.mxu3 %v1479_v23 }
 0x1f2   : > { %1119 = vmatpush.bf16.msra.mxu3 %v1478_v27 }
 0x268   : > { %v927_v42 = vpop.f32.mrf.mxu0 }
 0x269   : > { %v928_v43 = vadd.f32 %v1588_v41, %v927_v42 }
 0x26b   : > { %v931_v44 = vpack.c.bf16 %v928_v43, %v928_v43 }
 0x26d   : > { %1426 = vmatmul.msk.bf16.vlgmr.msra.gmra.mxu1 %vm856_vm2, %v931_v44 }
 0x270   : > { %v929_v45 = vpop.f32.mrf.mxu0 }
 0x2ea   : > { %v964_v47 = vpop.f32.mrf.mxu1 }
 0x2eb   : > { %v965_v48 = vadd.f32 %v1589_v46, %v964_v47 }
 0x2ed   : > { %v2154_v49 = vadd.f32 %v965_v48, %v853_v7  ;;  %v1591_v7 = vld [vmem:[%s798_s17] ss:$0 sm:$0xff] }
 0x2ef   : > { %v971_v50 = vsel %vm856_vm2, %v2154_v49, 0.0 }
 0x2f0   : > { %972 = vadd.xlane.f32.xlu1 %v971_v50 }
 0x2f2   : > { %v966_v51 = vpop.f32.mrf.mxu1 }
 0x363   : > { %v973_v52 = vpop.xlane.xlu1 %972 }
 0x364   : > { %v974_v53 = vmul.f32 %v973_v52, %v866_v15 }
 0x366   : > { %v975_v54 = vsub.f32 %v2154_v49, %v974_v53 }
 0x368   : > { %v976_v55 = vmul.f32 %v975_v54, %v975_v54 }
 0x36a   : > { %v977_v56 = vsel %vm856_vm2, %v976_v55, 0.0 }
 0x36b   : > { %978 = vadd.xlane.f32.xlu1 %v977_v56 }
 0x3de   : > { %v979_v59 = vpop.xlane.xlu1 %978 }
 0x3df   : > { %v980_v60 = vmul.f32 %v979_v59, %v866_v15 }
 0x3e1   : > { %v981_v61 = vadd.f32 1e-05, %v980_v60 }
 0x3e3   : > { %1597 = vrsqrt.f32 %v981_v61  ;;  %vm988_vm8 = vweird.f32 %v981_v61 }
 0x3e9   : > { %v1598_v62 = vpop.eup %1597 }
 0x3ea   : > { %v983_v63 = vmul.f32 %v1598_v62, %v981_v61  ;;  %vm989_vm7 = vweird.f32 %v1598_v62 }
 0x3eb   : > { %vm990_vm9 = vmor %vm988_vm8, %vm989_vm7 }
 0x3ec   : > { %v984_v0 = vmul.f32 %v1598_v62, %v983_v63 }
 0x3ee   : > { %v985_v1 = vmul.f32 0.5, %v984_v0 }
 0x3f0   : > { %v986_v2 = vsub.f32 1.5, %v985_v1 }
 0x3f2   : > { %v987_v4 = vmul.f32 %v1598_v62, %v986_v2 }
 0x3f4   : > { %v991_v5 = vsel %vm990_vm9, %v1598_v62, %v987_v4 }
 0x3f5   : > { %v995_v6 = vmul.f32 %v1590_v3, %v991_v5 }
 0x3f7   : > { %v996_v8 = vmul.f32 %v995_v6, %v975_v54  ;;  %v1592_v54 = vld [vmem:[%s814_s10] ss:$0 sm:$0xff] }
 0x3f9   : > { %v1000_v9 = vadd.f32 %v1591_v7, %v996_v8 }
 0x3fb   : > { %v1001_v10 = vpack.c.bf16 %v1000_v9, %v1000_v9 }
 0x3fd   : > { %1435 = vmatmul.msk.bf16.vlgmr.msra.gmra.mxu2 %vm856_vm2, %v1001_v10 }
 0x480   : > { %v1030_v15 = vpop.f32.mrf.mxu2 }
 0x481   : > { %v1034_v16 = vpack.c.bf16 %v1030_v15, %v1030_v15 }
 0x483   : > { %v1041_v19 = vunpack.c.l.bf16 %v1034_v16 }
 0x485   : > { %v1043_v21 = vadd.f32 %v1042_v17, %v1041_v19 }
 0x487   : > { %v1044_v22 = vpack.c.bf16 %v1043_v21, %v1043_v21 }
 0x488   : > { %v1032_v24 = vpop.f32.mrf.mxu2 }
 0x489   : > { %v1045_v25 = vunpack.c.l.bf16 %v1044_v22 }
 0x48b   : > { %v1046_v26 = vmul.f32 %v1045_v25, %v1045_v25 }
 0x48d   : > { %v1047_v28 = vpack.c.bf16 %v1046_v26, %v1046_v26 }
 0x48f   : > { %v1048_v29 = vunpack.c.l.bf16 %v1047_v28 }
 0x491   : > { %v1049_v30 = vmul.f32 %v1048_v29, %v1045_v25 }
 0x493   : > { %v1050_v31 = vpack.c.bf16 %v1049_v30, %v1049_v30 }
 0x495   : > { %v1051_v32 = vunpack.c.l.bf16 %v1050_v31 }
 0x497   : > { %v1052_v33 = vmul.f32 0.044677734, %v1051_v32 }
 0x499   : > { %v1053_v34 = vpack.c.bf16 %v1052_v33, %v1052_v33 }
 0x49b   : > { %v1054_v35 = vunpack.c.l.bf16 %v1053_v34 }
 0x49d   : > { %v1055_v36 = vadd.f32 %v1054_v35, %v1045_v25 }
 0x49f   : > { %v1056_v37 = vpack.c.bf16 %v1055_v36, %v1055_v36 }
 0x4a1   : > { %v1057_v38 = vunpack.c.l.bf16 %v1056_v37 }
 0x4a3   : > { %v1058_v39 = vmul.f32 0.796875, %v1057_v38 }
 0x4a5   : > { %v1059_v40 = vpack.c.bf16 %v1058_v39, %v1058_v39 }
 0x4a7   : > { %v1060_v41 = vunpack.c.l.bf16 %v1059_v40 }
 0x4a9   : > { %1599 = vtanh.f32 %v1060_v41 }
 0x4af   : > { %v1600_v42 = vpop.eup %1599 }
 0x4b0   : > { %v1062_v43 = vpack.c.bf16 %v1600_v42, %v1600_v42 }
 0x4b2   : > { %v1063_v44 = vunpack.c.l.bf16 %v1062_v43 }
 0x4b4   : > { %v1064_v45 = vadd.f32 1.0, %v1063_v44 }
 0x4b6   : > { %v1065_v46 = vpack.c.bf16 %v1064_v45, %v1064_v45 }
 0x4b8   : > { %v1066_v47 = vunpack.c.l.bf16 %v1065_v46 }
 0x4ba   : > { %v1067_v48 = vmul.f32 0.5, %v1066_v47 }
 0x4bc   : > { %v1068_v50 = vpack.c.bf16 %v1067_v48, %v1067_v48 }
 0x4be   : > { %v1069_v51 = vunpack.c.l.bf16 %v1068_v50 }
 0x4c0   : > { %v1070_v52 = vmul.f32 %v1069_v51, %v1045_v25 }
 0x4c2   : > { %v1071_v53 = vpack.c.bf16 %v1070_v52, %v1070_v52 }
 0x4c4   : > { %1452 = vmatmul.msk.bf16.vlgmr.msra.gmra.mxu3 %vm1108_vm10, %v1071_v53 }
 0x547   : > { %v1121_v55 = vpop.f32.mrf.mxu3 }
 0x548   : > { %v1122_v56 = vadd.f32 %v1592_v54, %v1121_v55 }
 0x54a   : > { %v1125_v57 = vadd.f32 %v1122_v56, %v2154_v49 }
 0x54b   : > { %1130 = sbr.rel (%p1453_p3) target bundleno = 1502 (0x5de), region = 116 }
 0x54c   : > { %1126 = vst.msk [vmem:[#allocation2] sm:$0xff] %vm856_vm2, %v1125_v57 }
 0x54f   : > { %v1123_v58 = vpop.f32.mrf.mxu3 }
 0x550   : > { %v1483_v59 = vld [vmem:[#allocation10 + $0x8] sm:$0xff]  ;;  %v1482_v60 = vld [vmem:[#allocation10] sm:$0xff]  ;;  %v1131_v61 = vpack.c.bf16 %v1125_v57, %v1125_v57 }
 0x551   : > { %1161 = vmatpush.bf16.msra.mxu0 %v1483_v59  ;;  %v1601_v62 = vld [vmem:[%s2283_s20] ss:$0 sm:$0xff] }
 0x555   : > { %1162 = vmatpush.bf16.msra.mxu0 %v1482_v60 }
 0x558   : > { %1462 = vmatmul.msk.bf16.vlgmr.msra.gmra.mxu0 %vm856_vm2, %v1131_v61 }
 0x5d5   : > { %v1164_v63 = vpop.f32.mrf.mxu0 }
 0x5d6   : > { %v1165_v0 = vadd.f32 %v1601_v62, %v1164_v63 }
 0x5d8   : > { %1168 = vst [vmem:[#allocation11] sm:$0xff] %v1165_v0 }
 0x5dd   : > { %v1166_v49 = vpop.f32.mrf.mxu0 }
 0x5de PF: > { %p1528_p4 = scmp.eq.s32.totalorder %s1974_s0, 1  ;;  %s2284_s10 = sld [smem:[#allocation37_spill]] }
 0x5df   : > { %s1854_s5 = smov [#allocation11]  }
 0x5e0   : > { %s1177_s30 = sshll.u32 %s1854_s5, 4  ;;  %s1178_s30 = int_to_ptr.vmem [resolvable:$true] %s1177_s30 }
 0x5e4   : > { %s1179_s3 = sshll.u32 %s2284_s10, 4  ;;  %s1180_s3 = int_to_ptr.hbm [resolvable:$true] %s1179_s3 }
 0x5e5   : > { %1501 = dma.vmem_to_hbm [thread:$0]  (%p1528_p4), %s1178_s30, 128, %s1180_s3, [#allocation5]  }
 0x5e6   : > { %1821 = dma.done.wait (%p1528_p4), [#allocation5], 128  }
 0x5e7   : > { %1823 = vsyncadd (%p1528_p4), [#allocation5], 4294967168 }
 0x5e8 PF: > { %s2285_s28 = sld [smem:[#allocation20_spill]] }
 0x5e9   : > { %s2286_s24 = sld [smem:[#allocation17_spill]] }
 0x5ea   : > { %s2287_s25 = sld [smem:[#allocation18_spill]] }
 0x5eb   : > { %s2288_s26 = sld [smem:[#allocation22_spill]] }
 0x5ec   : > { %s2289_s27 = sld [smem:[#allocation19_spill]] }
 0x5ee   : > { %s30_s29 = sadd.s32 1, %s2285_s28   ;;  %s2290_s28 = sld [smem:[#allocation21_spill]] }
 0x5ef   : > { %p27_p5 = scmp.ge.s32.totalorder %s30_s29, 4  }
 0x5f1   :  { %29 = sbr.rel (!%p27_p5) target bundleno = 21 (0x15), region = 187 }
 0x5f6   :  { %1193 = vsyncpa [#allocation4], 1 }
 0x5f7   :  { %1195 = vsyncpa [#allocation4 + $0x1], 1 }
 0x5f8   :  { %1196 = vsyncpa [#allocation7], 1 }
 0x5f9   :  { %1197 = vsyncpa [#allocation5], 1 }
 0x5fa   :  { %1199 = vsyncpa [#allocation5 + $0x1], 1 }

</bundles_post_ra>
